<compile_context>
chip_gen: v6e
topology: v6e:2x2x1
jax: 0.10.0
libtpu: 0.0.40
codegen_flags: <defaults>
</compile_context>

<pallas_src>
import numpy as np
import jax
import jax.numpy as jnp
from jax.experimental import pallas as pl
from jax.experimental.pallas import tpu as pltpu


# ----------------------------- config (synthetic, deterministic) ------------
CFG = {
    "data": {
        "sample_rate": 16000,
        "nfft": 256,
        "hoplen": 128,
        "window": "hann",
        "n_mels": 64,
    }
}
AMIN = 1e-10
REF = 1.0
LANE = 128


def _round_up(x, m):
    return (x + m - 1) // m * m


# ----------------------------- parameter construction (glue) ----------------
def _hz_to_mel(f):
    # Slaney mel scale (librosa default, htk=False)
    f = np.asarray(f, dtype=np.float64)
    f_sp = 200.0 / 3.0
    mels = f / f_sp
    min_log_hz = 1000.0
    min_log_mel = min_log_hz / f_sp
    logstep = np.log(6.4) / 27.0
    mels = np.where(
        f >= min_log_hz,
        min_log_mel + np.log(np.maximum(f, 1e-12) / min_log_hz) / logstep,
        mels,
    )
    return mels


def _mel_to_hz(m):
    m = np.asarray(m, dtype=np.float64)
    f_sp = 200.0 / 3.0
    freqs = f_sp * m
    min_log_hz = 1000.0
    min_log_mel = min_log_hz / f_sp
    logstep = np.log(6.4) / 27.0
    freqs = np.where(
        m >= min_log_mel, min_log_hz * np.exp(logstep * (m - min_log_mel)), freqs
    )
    return freqs


def make_mel_filterbank(sr, n_fft, n_mels, fmin, fmax):
    """librosa.filters.mel (Slaney norm), returned transposed: (n_freq, n_mels)."""
    n_freq = n_fft // 2 + 1
    fftfreqs = np.linspace(0.0, sr / 2.0, n_freq)
    mel_pts = np.linspace(_hz_to_mel(fmin), _hz_to_mel(fmax), n_mels + 2)
    mel_f = _mel_to_hz(mel_pts)
    fdiff = np.diff(mel_f)
    ramps = mel_f[:, None] - fftfreqs[None, :]
    lower = -ramps[:-2] / fdiff[:-1, None]
    upper = ramps[2:] / fdiff[1:, None]
    weights = np.maximum(0.0, np.minimum(lower, upper))
    enorm = 2.0 / (mel_f[2 : n_mels + 2] - mel_f[:n_mels])
    weights = weights * enorm[:, None]           # (n_mels, n_freq)
    return np.ascontiguousarray(weights.T).astype(np.float32)  # (n_freq, n_mels)


def make_stft_matrices(n_fft):
    """Windowed real-DFT matrices (torchlibrosa conv-STFT kernels), shape (n_fft, n_freq)."""
    n_freq = n_fft // 2 + 1
    n = np.arange(n_fft, dtype=np.float64)
    k = np.arange(n_freq, dtype=np.float64)
    ang = 2.0 * np.pi * np.outer(n, k) / n_fft
    win = 0.5 - 0.5 * np.cos(2.0 * np.pi * n / n_fft)   # periodic Hann
    w_real = (win[:, None] * np.cos(ang)).astype(np.float32)
    w_imag = (-win[:, None] * np.sin(ang)).astype(np.float32)
    return w_real, w_imag


def make_packed_weights(sr, n_fft, n_mels, fmin, fmax):
    """Fused, lane-padded weights.

    Returns:
      w_fused : (n_fft, 2*F_pad) -- cols [0:n_freq]          = windowed-DFT real part
                                    cols [F_pad:F_pad+n_freq] = windowed-DFT imag part
                                    everything else exact zeros.
      mel_pad : (F_pad, N_pad)   -- mel filterbank, zero rows/cols beyond (n_freq, n_mels).
    """
    n_freq = n_fft // 2 + 1
    f_pad = _round_up(n_freq, LANE)
    n_pad = _round_up(n_mels, LANE)
    w_real, w_imag = make_stft_matrices(n_fft)
    w_fused = np.zeros((n_fft, 2 * f_pad), dtype=np.float32)
    w_fused[:, :n_freq] = w_real
    w_fused[:, f_pad : f_pad + n_freq] = w_imag
    melW = make_mel_filterbank(sr, n_fft, n_mels, fmin, fmax)  # (n_freq, n_mels)
    mel_pad = np.zeros((f_pad, n_pad), dtype=np.float32)
    mel_pad[:n_freq, :n_mels] = melW
    return w_fused, mel_pad


# ----------------------------- Pallas kernel ---------------------------------
def _logmel_kernel(frames_ref, w_ref, mel_ref, out_ref):
    # frames_ref: (tm, n_fft) bf16
    # w_ref     : (n_fft, 2*F_pad) bf16 (real | imag halves, zero-padded, lane-aligned)
    # mel_ref   : (F_pad, N_pad) bf16 (zero-padded)
    # out_ref   : (tm, N_pad) f32
    x = frames_ref[...]
    y = jnp.dot(x, w_ref[...], preferred_element_type=jnp.float32)   # (tm, 2*F_pad)
    f_pad = w_ref.shape[1] // 2
    re = y[:, :f_pad]                                                 # lane-aligned slice
    im = y[:, f_pad:]
    power = re * re + im * im                                         # |X|^2, (tm, F_pad) f32
    melspec = jnp.dot(power.astype(mel_ref.dtype), mel_ref[...],
                      preferred_element_type=jnp.float32)             # (tm, N_pad)
    # power_to_db with ref=1.0, amin=1e-10, top_db=None
    out_ref[...] = 10.0 * jnp.log10(jnp.maximum(melspec, AMIN))


def logmel_pallas(frames2d, w_fused, mel_pad, tm):
    """frames2d: (M_pad, n_fft) bf16, M_pad % tm == 0.  Returns (M_pad, N_pad) f32."""
    m_pad, n_fft = frames2d.shape
    f2 = w_fused.shape[1]
    n_pad = mel_pad.shape[1]
    grid = (m_pad // tm,)
    return pl.pallas_call(
        _logmel_kernel,
        out_shape=jax.ShapeDtypeStruct((m_pad, n_pad), jnp.float32),
        grid_spec=pltpu.PrefetchScalarGridSpec(
            num_scalar_prefetch=0,
            grid=grid,
            in_specs=[
                pl.BlockSpec((tm, n_fft), lambda i: (i, 0)),
                # constant block index -> weights stay resident, no per-step re-DMA
                pl.BlockSpec((n_fft, f2), lambda i: (0, 0)),
                pl.BlockSpec(mel_pad.shape, lambda i: (0, 0)),
            ],
            out_specs=pl.BlockSpec((tm, n_pad), lambda i: (i, 0)),
        ),
        compiler_params=pltpu.CompilerParams(
            dimension_semantics=("parallel",),
            vmem_limit_bytes=32 << 20,   # headroom over v5e's 16 MiB default; safe on v7x (64 MiB)
        ),
    )(frames2d, w_fused, mel_pad)


def _pick_tm(m, tm_max=1024):
    """Row tile: multiple of 8, as large as possible but keeping >=2 grid steps (v7x megacore)."""
    half = -(-m // 2)                       # ceil(m / 2)
    return max(8, min(tm_max, _round_up(half, 8)))


# ----------------------------- wrapper (glue + kernel) -----------------------
def logmel_extractor(x, cfg=CFG, tm_max=1024):
    """x: (B, C, data_length) float32 -> (B, C, time_steps, n_mels) float32."""
    if x.ndim != 3:
        raise ValueError(
            "x shape must be (batch_size, num_channels, data_length) Now it is {}".format(
                x.shape
            )
        )
    data = cfg["data"]
    sr, n_fft, hop, n_mels = (
        data["sample_rate"],
        data["nfft"],
        data["hoplen"],
        data["n_mels"],
    )
    B, C, L = x.shape

    # center=True, pad_mode='reflect' framing (glue)
    pad = n_fft // 2
    xp = jnp.pad(x, ((0, 0), (0, 0), (pad, pad)), mode="reflect")
    T = L // hop + 1
    if n_fft % hop == 0:
        # frame[t] = concat(chunk[t], ..., chunk[t + n_fft//hop - 1]) -- cheap static slices,
        # avoids the XLA gather of advanced indexing.
        r = n_fft // hop
        n_chunks = T + r - 1
        chunks = xp[:, :, : n_chunks * hop].reshape(B, C, n_chunks, hop)
        frames = jnp.concatenate(
            [chunks[:, :, j : j + T, :] for j in range(r)], axis=-1
        )                                              # (B, C, T, n_fft)
    else:
        idx = jnp.arange(T)[:, None] * hop + jnp.arange(n_fft)[None, :]
        frames = xp[:, :, idx]                         # (B, C, T, n_fft)

    M = B * C * T
    frames2d = frames.reshape(M, n_fft).astype(jnp.bfloat16)

    tm = _pick_tm(M, tm_max)
    M_pad = _round_up(M, tm)
    if M_pad != M:
        frames2d = jnp.pad(frames2d, ((0, M_pad - M), (0, 0)))

    # deterministic "parameters" (frozen buffers of the module), fused & lane-padded
    w_fused, mel_pad = make_packed_weights(sr, n_fft, n_mels, fmin=20.0, fmax=sr / 2.0)

    out = logmel_pallas(
        frames2d,
        jnp.asarray(w_fused, dtype=jnp.bfloat16),
        jnp.asarray(mel_pad, dtype=jnp.bfloat16),
        tm=tm,
    )
    # drop padded rows / padded mel lanes, restore (B, C, T, n_mels)
    return out[:M, :n_mels].reshape(B, C, T, n_mels)


# ----------------------------- main ------------------------------------------
if __name__ == "__main__":
    key = jax.random.PRNGKey(0)
    B, C, L = 2, 4, 1024                     # small synthetic waveform batch
    x = jax.random.normal(key, (B, C, L), dtype=jnp.float32)

    out = logmel_extractor(x)
    out = jax.block_until_ready(out)

    expected_T = L // CFG["data"]["hoplen"] + 1
    assert out.shape == (B, C, expected_T, CFG["data"]["n_mels"]), out.shape
    assert bool(jnp.all(jnp.isfinite(out)))

    print("KERNEL_OK")
</pallas_src>

<mosaic_0001>
module attributes {stable_mosaic.version = 11 : i64} {
  func.func @_logmel_kernel(%arg0: i32, %arg1: memref<40x256xbf16, #tpu.memory_space<vmem>>, %arg2: memref<256x512xbf16, #tpu.memory_space<vmem>>, %arg3: memref<256x128xbf16, #tpu.memory_space<vmem>>, %arg4: memref<40x128xf32, #tpu.memory_space<vmem>>) attributes {dimension_semantics = [#tpu.dimension_semantics<parallel>], iteration_bounds = array<i64: 2>, scalar_prefetch = 0 : i64, scratch_operands = 0 : i64, tpu.core_type = #tpu.core_type<tc>, window_params = [{transform_indices = @transform_0, window_bounds = array<i64: 40, 256>}, {pipeline_mode = #tpu.pipeline_mode<synchronous>, transform_indices = @transform_1, window_bounds = array<i64: 256, 512>}, {pipeline_mode = #tpu.pipeline_mode<synchronous>, transform_indices = @transform_2, window_bounds = array<i64: 256, 128>}, {transform_indices = @transform_3, window_bounds = array<i64: 40, 128>}]} {
    %c0 = arith.constant 0 : index
    %c0_0 = arith.constant 0 : index
    %0 = vector.load %arg1[%c0, %c0_0] : memref<40x256xbf16, #tpu.memory_space<vmem>>, vector<40x256xbf16>
    %c0_1 = arith.constant 0 : index
    %c0_2 = arith.constant 0 : index
    %1 = vector.load %arg2[%c0_1, %c0_2] : memref<256x512xbf16, #tpu.memory_space<vmem>>, vector<256x512xbf16>
    %cst = arith.constant dense<0.000000e+00> : vector<40x512xf32>
    %2 = tpu.matmul %0, %1, %cst {dimension_numbers = #tpu.dot_dimension_numbers<[1], [0], [0], [1], [0, 0, 1, 1], [], []>} : vector<40x256xbf16>, vector<256x512xbf16>, vector<40x512xf32> -> vector<40x512xf32>
    %3 = vector.extract_strided_slice %2 {offsets = [0, 0], sizes = [40, 256], strides = [1, 1]} : vector<40x512xf32> to vector<40x256xf32>
    %4 = vector.extract_strided_slice %2 {offsets = [0, 256], sizes = [40, 256], strides = [1, 1]} : vector<40x512xf32> to vector<40x256xf32>
    %5 = arith.mulf %3, %3 : vector<40x256xf32>
    %6 = arith.mulf %4, %4 : vector<40x256xf32>
    %7 = arith.addf %5, %6 : vector<40x256xf32>
    %8 = arith.truncf %7 : vector<40x256xf32> to vector<40x256xbf16>
    %c0_3 = arith.constant 0 : index
    %c0_4 = arith.constant 0 : index
    %9 = vector.load %arg3[%c0_3, %c0_4] : memref<256x128xbf16, #tpu.memory_space<vmem>>, vector<256x128xbf16>
    %cst_5 = arith.constant dense<0.000000e+00> : vector<40x128xf32>
    %10 = tpu.matmul %8, %9, %cst_5 {dimension_numbers = #tpu.dot_dimension_numbers<[1], [0], [0], [1], [0, 0, 1, 1], [], []>} : vector<40x256xbf16>, vector<256x128xbf16>, vector<40x128xf32> -> vector<40x128xf32>
    %cst_6 = arith.constant 1.000000e-10 : f32
    %11 = vector.broadcast %cst_6 : f32 to vector<40x128xf32>
    %12 = arith.maximumf %10, %11 : vector<40x128xf32>
    %13 = math.log %12 : vector<40x128xf32>
    %cst_7 = arith.constant 0.434294492 : f32
    %14 = vector.broadcast %cst_7 : f32 to vector<40x128xf32>
    %15 = arith.mulf %13, %14 : vector<40x128xf32>
    %cst_8 = arith.constant 1.000000e+01 : f32
    %16 = vector.broadcast %cst_8 : f32 to vector<40x128xf32>
    %17 = arith.mulf %16, %15 : vector<40x128xf32>
    %c0_9 = arith.constant 0 : index
    %c0_10 = arith.constant 0 : index
    %18 = vector.load %arg4[%c0_9, %c0_10] : memref<40x128xf32, #tpu.memory_space<vmem>>, vector<40x128xf32>
    tpu.vector_store %arg4[%c0_9, %c0_10], %17 {strides = array<i32>} : memref<40x128xf32, #tpu.memory_space<vmem>>, vector<40x128xf32>,
    return
  }
  func.func @transform_0(%arg0: i32) -> (i32, i32) {
    %c0_i32 = arith.constant 0 : i32
    %c0_i32_0 = arith.constant 0 : i32
    return %arg0, %c0_i32 : i32, i32
  }
  func.func @transform_1(%arg0: i32) -> (i32, i32) {
    %c0_i32 = arith.constant 0 : i32
    %c0_i32_0 = arith.constant 0 : i32
    %c0_i32_1 = arith.constant 0 : i32
    return %c0_i32, %c0_i32_0 : i32, i32
  }
  func.func @transform_2(%arg0: i32) -> (i32, i32) {
    %c0_i32 = arith.constant 0 : i32
    %c0_i32_0 = arith.constant 0 : i32
    %c0_i32_1 = arith.constant 0 : i32
    return %c0_i32, %c0_i32_0 : i32, i32
  }
  func.func @transform_3(%arg0: i32) -> (i32, i32) {
    %c0_i32 = arith.constant 0 : i32
    %c0_i32_0 = arith.constant 0 : i32
    return %arg0, %c0_i32 : i32, i32
  }
}

</mosaic_0001>

<bundles_post_ra>
// kernel: tpu_custom_call.1
= control target key start
LH: loop header
LB: loop body
LE: loop exit
PB: predicated region body
PF: predicated region fallthrough
CT: control target
= control target key end

     0   :  { %8 = vsyncpa [#allocation3], 0  ;;  %s1857_s0 = inlined_call_operand.hbm [shape: bf16[80,256], index: 0, kind: input, shape index: {}]   ;;  %s1858_s1 = inlined_call_operand.hbm [shape: bf16[256,512], index: 1, kind: input, shape index: {}]   ;;  %s1859_s2 = inlined_call_operand.hbm [shape: bf16[256,128], index: 2, kind: input, shape index: {}]   ;;  %s1860_s3 = inlined_call_operand.hbm [shape: f32[80,128], index: 3, kind: output, shape index: {}]  }
   0x1   :  { %10 = vsyncpa [#allocation3 + $0x1], 0 }
   0x2   :  { %11 = vsyncpa [#allocation6], 0 }
   0x3   :  { %12 = vsyncpa [#allocation4], 0 }
   0x4   :  { %14 = vsyncpa [#allocation4 + $0x1], 0  ;;  %s1658_s12 = smov 0   ;;  %s1660_s13 = smov 0  }
   0x5   :  { %s1662_s14 = smov 0   ;;  %s1664_s15 = smov 0  }
   0x6 LB: > { %s1679_s16 = sadd.s32 4294967295, %s1624_s15   ;;  %s1116_s17 = sadd.s32 4294967294, %s1624_s15   ;;  %s1624_s15 = sphi %s1664_s15, %s1882_s15   ;;  %s1620_s14 = sphi %s1662_s14, %s1881_s14   ;;  %s1616_s13 = sphi %s1660_s13, %s1880_s13   ;;  %s1612_s12 = sphi %s1658_s12, %s1879_s12  }
   0x7   : > { %p40_p0 = scmp.ne.s32.totalorder %s1616_s13, %s1612_s12  ;;  %p1861_p1 = scmp.eq.s32.totalorder %s1679_s16, 0 }
   0x8   : > { %p112_p3 = scmp.eq.s32.totalorder %s1116_s17, 1  ;;  %p1117_p5 = scmp.ge.s32.totalorder %s1624_s15, 1 }
   0x9   : > { %p1688_p4 = por %p1861_p1, %p40_p0  ;;  %p119_p7 = scmp.lt.s32.totalorder %s1624_s15, 3 }
   0xa   : > { %p1693_p6 = por %p112_p3, %p40_p0  ;;  %s1626_s21 = smov [#allocation5]  }
   0xb   : > { %s1865_s18 = scalar_select %p1688_p4, 1, 0 }
   0xc   : > { %s1866_s19 = scalar_select %p1693_p6, 1, 0 }
   0xd   : > { %p1698_p8 = pnand %p1117_p5, %p119_p7  ;;  %s131_s22 = sshll.u32 %s1626_s21, 4  ;;  %s132_s22 = int_to_ptr.vmem [resolvable:$true] %s131_s22 }
   0xe   : > { %s1627_s24 = smov [#allocation7]   ;;  %s1487_s26 = scalar_lea.vmem %s132_s22, 8192 }
   0xf   : > { %s1867_s20 = scalar_select %p1698_p8, 1, 0 }
  0x10   : > { %p1283_p9 = pneg %p1698_p8  ;;  %s144_s25 = sshll.u32 %s1627_s24, 4  ;;  %s145_s25 = int_to_ptr.vmem [resolvable:$true] %s144_s25 }
  0x11   : > { %p1488_p13 = scmp.ne.s32.totalorder %s132_s22, %s1487_s26  ;;  %p1495_p5 = scmp.lt.s32.totalorder %s132_s22, %s132_s22 }
  0x12   : > { %p1707_p11 = pnand %p1283_p9, %p1861_p1  ;;  %p1496_p7 = scmp.lt.s32.totalorder %s1487_s26, %s1487_s26 }
  0x14   : > { %p1478_p12 = pneg %p1707_p11  ;;  %p1497_p10 = por %p1496_p7, %p1495_p5 }
  0x16   : > { %p1490_p0 = pnand %p1488_p13, %p1478_p12 }
  0x18   : > { %p1491_p3 = pneg %p1490_p0 }
  0x1a   : > { %p1498_p9 = pnand %p1497_p10, %p1491_p3 }
  0x1c   : > { %1501 = shalt.err (!%p1498_p9)
}
  0x1d   : > { %s1628_s27 = smov 256   ;;  %s1629_s28 = smov 16  }
  0x1e   : > { %1286 = dma.hbm_to_vmem [thread:$0]  (!%p1707_p11), %s1858_s1, 8192, %s132_s22, [#allocation6], %s1628_s27, %s1628_s27, %s1629_s28  }
  0x1f   : > { %s1513_s4 = scalar_lea.vmem %s145_s25, 2048  ;;  %p1521_p2 = scmp.lt.s32.totalorder %s145_s25, %s145_s25 }
  0x20   : > { %p1514_p1 = scmp.ne.s32.totalorder %s145_s25, %s1513_s4  ;;  %p1522_p6 = scmp.lt.s32.totalorder %s1513_s4, %s1513_s4 }
  0x22   : > { %p1516_p13 = pnand %p1514_p1, %p1478_p12  ;;  %p1523_p5 = por %p1522_p6, %p1521_p2 }
  0x24   : > { %p1517_p0 = pneg %p1516_p13 }
  0x26   : > { %p1524_p10 = pnand %p1523_p5, %p1517_p0 }
  0x28   : > { %1527 = shalt.err (!%p1524_p10)
}
  0x29   : > { %s1630_s5 = smov 64   ;;  %s1631_s6 = smov 4  }
  0x2a   : > { %1289 = dma.hbm_to_vmem [thread:$0]  (!%p1707_p11), %s1859_s2, 2048, %s145_s25, [#allocation6], %s1630_s5, %s1630_s5, %s1631_s6  }
  0x2b   : > { %s1730_s9 = sadd.s32 1, %s1624_s15   ;;  %s27_s11 = sadd.s32 1, %s1620_s14 }
  0x2c   : > { %s24_s10 = ssub.s32 %s1624_s15, %s1730_s9  ;;  %p34_p2 = scmp.ne.s32.totalorder %s1620_s14, %s1616_s13 }
  0x2d   : > { %p25_p1 = scmp.eq.s32.totalorder %s24_s10, 0  ;;  %p35_p6 = scmp.eq.s32.totalorder %s1624_s15, 0 }
  0x2e   : > { %p1869_p3 = scmp.eq.s32.totalorder %s1679_s16, 1  ;;  %p1300_p9 = scmp.lt.s32.totalorder %s1624_s15, 2 }
  0x2f   : > { %s1739_s17 = scalar_select %p25_p1, %s1620_s14, %s27_s11  }
  0x30   : > { %p36_p12 = por %p35_p6, %p34_p2  ;;  %p1743_p7 = por %p1869_p3, %p34_p2 }
  0x31   : > { %s158_s22 = sand.u32 1, %s1620_s14   ;;  %s1218_s24 = smul.u32 640, %s1624_s15 }
  0x32   : > { %s1870_s21 = scalar_select %p1743_p7, 1, 0 }
  0x33   : > { %s1269_s23 = smul.u32 40, %s158_s22  ;;  %p1750_p11 = pnand %p1300_p9, %p36_p12 }
  0x34   : > { %s1757_s28 = scalar_lea.hbm %s1857_s0, %s1218_s24  ;;  %s1761_s4 = scalar_lea.sflag [#allocation3], %s158_s22 }
  0x35   : > { %s162_s29 = scalar_lea.vmem [#allocation2], %s1269_s23  ;;  %s1528_s5 = scalar_lea.hbm %s1757_s28, 640 }
  0x36   : > { %s170_s30 = sshll.u32 %s162_s29, 4  ;;  %p1529_p13 = scmp.ne.s32.totalorder %s1757_s28, %s1528_s5  ;;  %s1759_s30 = int_to_ptr.vmem [resolvable:$true] %s170_s30 }
  0x37   : > { %p1530_p0 = pneg %p1750_p11  ;;  %s1533_s8 = scalar_lea.hbm %s1857_s0, 1280 }
  0x38   : > { %p1534_p1 = scmp.lt.s32.totalorder %s1757_s28, %s1857_s0  ;;  %p1535_p2 = scmp.lt.s32.totalorder %s1533_s8, %s1528_s5 }
  0x39   : > { %p1531_p5 = pnand %p1530_p0, %p1529_p13 }
  0x3a   : > { %p1536_p6 = por %p1535_p2, %p1534_p1 }
  0x3b   : > { %p1532_p10 = pneg %p1531_p5 }
  0x3d   : > { %p1537_p12 = pnand %p1536_p6, %p1532_p10 }
  0x3f   : > { %1540 = shalt.err (!%p1537_p12)
}
  0x40   : > { %s1541_s22 = scalar_lea.vmem %s1759_s30, 640  ;;  %s1632_s23 = smov [#allocation2]  }
  0x41   : > { %p1542_p3 = scmp.ne.s32.totalorder %s1759_s30, %s1541_s22  ;;  %s1546_s24 = sshll.u32 %s1632_s23, 4  ;;  %s1547_s24 = int_to_ptr.vmem [resolvable:$false] %s1546_s24 }
  0x42   : > { %s1548_s26 = scalar_lea.vmem %s1547_s24, 1280  ;;  %p1549_p5 = scmp.lt.s32.totalorder %s1759_s30, %s1547_s24 }
  0x43   : > { %p1544_p9 = pnand %p1542_p3, %p1530_p0  ;;  %p1550_p7 = scmp.lt.s32.totalorder %s1548_s26, %s1541_s22 }
  0x45   : > { %p1545_p13 = pneg %p1544_p9  ;;  %p1551_p4 = por %p1550_p7, %p1549_p5 }
  0x47   : > { %p1552_p8 = pnand %p1551_p4, %p1545_p13 }
  0x49   : > { %1555 = shalt.err (!%p1552_p8)
}
  0x4a   : > { %s1633_s27 = smov 128   ;;  %s1634_s29 = smov 8  }
  0x4b   : > { %1293 = dma.hbm_to_vmem [thread:$0]  (!%p1750_p11), %s1757_s28, 640, %s1759_s30, %s1761_s4, %s1633_s27, %s1633_s27, %s1634_s29  }
  0x4c   : > { %p1872_p0 = scmp.ne.s32.totalorder %s1867_s20, 0 }
  0x4d   : > { %s1785_s5 = sand.u32 (!%p1872_p0), 1, %s1616_s13   ;;  %p1873_p4 = scmp.ne.s32.totalorder (!%p1872_p0), %s1865_s18, 0 }
  0x4e   : > { %182 = sbr.rel (%p1872_p0) target bundleno = 607 (0x25f), region = 32  ;;  %s185_s7 = scalar_lea.sflag (!%p1872_p0), [#allocation3], %s1785_s5 }
  0x4f   : > { %s1270_s6 = smul.u32 (!%p1872_p0), 40, %s1785_s5 }
  0x51   : > { %s1791_s8 = scalar_lea.vmem (!%p1872_p0), [#allocation2], %s1270_s6 }
  0x53   : > { %1599 = dma.done.wait (%p1873_p4), %s185_s7, 640  }
  0x54   : > { %1601 = vsyncadd (%p1873_p4), %s185_s7, 4294966656  ;;  %p1874_p8 = scmp.eq.s32.totalorder %s1679_s16, 0 }
  0x56   : > { %1603 = dma.done.wait (%p1874_p8), [#allocation6], 10240   ;;  %p1875_p7 = pmov %p1874_p8 }
  0x57   : > { %v1346_v0 = vld [vmem:[#allocation5 + $0xe4] ss:$16 sps:$4 sm:$0xff]   ;;  %v1348_v1 = vld [vmem:[#allocation5 + $0xec] ss:$16 sps:$4 sm:$0xff]   ;;  %v1350_v2 = vld [vmem:[#allocation5 + $0xe0] ss:$16 sps:$4 sm:$0xff]  }
  0x58   : > { %1605 = vsyncadd (%p1875_p7), [#allocation6], 4294957056  ;;  %638 = vmatprep.subr.bf16.mxu0 %v1346_v0  ;;  %v1351_v3 = vld [vmem:[#allocation5 + $0xe8] ss:$16 sps:$4 sm:$0xff]   ;;  %699 = vmatprep.subr.bf16.mxu1 %v1348_v1  ;;  %v1352_v4 = vld [vmem:[#allocation5 + $0xc4] ss:$16 sps:$4 sm:$0xff]  }
  0x59   : > { %639 = vmatpush1.bf16.msra.mxu0 %v1350_v2  ;;  %700 = vmatpush1.bf16.msra.mxu1 %v1351_v3  ;;  %v1354_v5 = vld [vmem:[#allocation5 + $0xcc] ss:$16 sps:$4 sm:$0xff]   ;;  %v1356_v6 = vld [vmem:[#allocation5 + $0xc0] ss:$16 sps:$4 sm:$0xff]   ;;  %v1357_v7 = vld [vmem:[#allocation5 + $0xc8] ss:$16 sps:$4 sm:$0xff]  }
  0x5a   : > { %640 = vmatprep.subr.bf16.mxu0 %v1352_v4  ;;  %701 = vmatprep.subr.bf16.mxu1 %v1354_v5  ;;  %v1358_v8 = vld [vmem:[#allocation5 + $0xa4] ss:$16 sps:$4 sm:$0xff]   ;;  %v1360_v9 = vld [vmem:[#allocation5 + $0xac] ss:$16 sps:$4 sm:$0xff]   ;;  %v1362_v10 = vld [vmem:[#allocation5 + $0xa0] ss:$16 sps:$4 sm:$0xff]  }
  0x5b   : > { %v1363_v11 = vld [vmem:[#allocation5 + $0xa8] ss:$16 sps:$4 sm:$0xff]   ;;  %v1364_v12 = vld [vmem:[#allocation5 + $0x84] ss:$16 sps:$4 sm:$0xff]   ;;  %v1366_v13 = vld [vmem:[#allocation5 + $0x8c] ss:$16 sps:$4 sm:$0xff]  }
  0x5c   : > { %v1368_v14 = vld [vmem:[#allocation5 + $0x80] ss:$16 sps:$4 sm:$0xff]   ;;  %v1369_v15 = vld [vmem:[#allocation5 + $0x88] ss:$16 sps:$4 sm:$0xff]   ;;  %v1370_v16 = vld [vmem:[#allocation5 + $0x64] ss:$16 sps:$4 sm:$0xff]  }
  0x5d   : > { %641 = vmatpush1.bf16.msra.mxu0 %v1356_v6  ;;  %702 = vmatpush1.bf16.msra.mxu1 %v1357_v7  ;;  %v1372_v17 = vld [vmem:[#allocation5 + $0x6c] ss:$16 sps:$4 sm:$0xff]   ;;  %v1374_v18 = vld [vmem:[#allocation5 + $0x60] ss:$16 sps:$4 sm:$0xff]   ;;  %v1375_v19 = vld [vmem:[#allocation5 + $0x68] ss:$16 sps:$4 sm:$0xff]  }
  0x5e   : > { %642 = vmatprep.subr.bf16.mxu0 %v1358_v8  ;;  %703 = vmatprep.subr.bf16.mxu1 %v1360_v9  ;;  %v1376_v20 = vld [vmem:[#allocation5 + $0x44] ss:$16 sps:$4 sm:$0xff]   ;;  %v1378_v21 = vld [vmem:[#allocation5 + $0x4c] ss:$16 sps:$4 sm:$0xff]   ;;  %v1380_v22 = vld [vmem:[#allocation5 + $0x40] ss:$16 sps:$4 sm:$0xff]  }
  0x5f   : > { %v1381_v23 = vld [vmem:[#allocation5 + $0x48] ss:$16 sps:$4 sm:$0xff]   ;;  %v1382_v24 = vld [vmem:[#allocation5 + $0x24] ss:$16 sps:$4 sm:$0xff]   ;;  %v1384_v25 = vld [vmem:[#allocation5 + $0x2c] ss:$16 sps:$4 sm:$0xff]  }
  0x60   : > { %v1386_v26 = vld [vmem:[#allocation5 + $0x20] ss:$16 sps:$4 sm:$0xff]   ;;  %v1387_v27 = vld [vmem:[#allocation5 + $0x28] ss:$16 sps:$4 sm:$0xff]   ;;  %v1388_v28 = vld [vmem:[#allocation5 + $0x4] ss:$16 sps:$4 sm:$0xff]  }
  0x61   : > { %643 = vmatpush1.bf16.msra.mxu0 %v1362_v10  ;;  %704 = vmatpush1.bf16.msra.mxu1 %v1363_v11  ;;  %v1390_v29 = vld [vmem:[#allocation5 + $0xc] ss:$16 sps:$4 sm:$0xff]   ;;  %v1392_v30 = vld [vmem:[#allocation5] ss:$16 sps:$4 sm:$0xff]   ;;  %v1393_v31 = vld [vmem:[#allocation5 + $0x8] ss:$16 sps:$4 sm:$0xff]  }
  0x62   : > { %644 = vmatprep.subr.bf16.mxu0 %v1364_v12  ;;  %705 = vmatprep.subr.bf16.mxu1 %v1366_v13  ;;  %v1394_v32 = vld [vmem:[#allocation5 + $0x1e4] ss:$16 sps:$4 sm:$0xff]   ;;  %v1396_v33 = vld [vmem:[#allocation5 + $0x1ec] ss:$16 sps:$4 sm:$0xff]   ;;  %v1398_v34 = vld [vmem:[#allocation5 + $0x1e0] ss:$16 sps:$4 sm:$0xff]  }
  0x63   : > { %v1399_v35 = vld [vmem:[#allocation5 + $0x1e8] ss:$16 sps:$4 sm:$0xff]   ;;  %v1400_v36 = vld [vmem:[#allocation5 + $0x1c4] ss:$16 sps:$4 sm:$0xff]   ;;  %v1402_v37 = vld [vmem:[#allocation5 + $0x1cc] ss:$16 sps:$4 sm:$0xff]  }
  0x64   : > { %v1404_v38 = vld [vmem:[#allocation5 + $0x1c0] ss:$16 sps:$4 sm:$0xff]   ;;  %v1405_v39 = vld [vmem:[#allocation5 + $0x1c8] ss:$16 sps:$4 sm:$0xff]   ;;  %v1406_v40 = vld [vmem:[#allocation5 + $0x1a4] ss:$16 sps:$4 sm:$0xff]  }
  0x65   : > { %645 = vmatpush1.bf16.msra.mxu0 %v1368_v14  ;;  %706 = vmatpush1.bf16.msra.mxu1 %v1369_v15  ;;  %v1408_v41 = vld [vmem:[#allocation5 + $0x1ac] ss:$16 sps:$4 sm:$0xff]   ;;  %v1410_v42 = vld [vmem:[#allocation5 + $0x1a0] ss:$16 sps:$4 sm:$0xff]   ;;  %v1411_v43 = vld [vmem:[#allocation5 + $0x1a8] ss:$16 sps:$4 sm:$0xff]  }
  0x66   : > { %646 = vmatprep.subr.bf16.mxu0 %v1370_v16  ;;  %707 = vmatprep.subr.bf16.mxu1 %v1372_v17  ;;  %v1412_v44 = vld [vmem:[#allocation5 + $0x184] ss:$16 sps:$4 sm:$0xff]   ;;  %v1414_v45 = vld [vmem:[#allocation5 + $0x18c] ss:$16 sps:$4 sm:$0xff]   ;;  %v1416_v46 = vld [vmem:[#allocation5 + $0x180] ss:$16 sps:$4 sm:$0xff]  }
  0x67   : > { %v1444_v47 = vld [vmem:[%s1791_s8 + $0x4] ss:$8 sps:$4 sm:$0xff]   ;;  %v1417_v48 = vld [vmem:[#allocation5 + $0x188] ss:$16 sps:$4 sm:$0xff]   ;;  %v1422_v51 = vld [vmem:[#allocation5 + $0x160] ss:$16 sps:$4 sm:$0xff]  }
  0x68   : > { %v1418_v49 = vld [vmem:[#allocation5 + $0x164] ss:$16 sps:$4 sm:$0xff]   ;;  %v1420_v50 = vld [vmem:[#allocation5 + $0x16c] ss:$16 sps:$4 sm:$0xff]   ;;  %670 = vmatprep.mubr.bf16.mxu0 %v1444_v47  ;;  %731 = vmatprep.mubr.bf16.mxu1 %v1444_v47  ;;  %v1423_v52 = vld [vmem:[#allocation5 + $0x168] ss:$16 sps:$4 sm:$0xff]  }
  0x69   : > { %647 = vmatpush1.bf16.msra.mxu0 %v1374_v18  ;;  %708 = vmatpush1.bf16.msra.mxu1 %v1375_v19  ;;  %v1424_v53 = vld [vmem:[#allocation5 + $0x144] ss:$16 sps:$4 sm:$0xff]   ;;  %v1426_v54 = vld [vmem:[#allocation5 + $0x14c] ss:$16 sps:$4 sm:$0xff]   ;;  %v1428_v55 = vld [vmem:[#allocation5 + $0x140] ss:$16 sps:$4 sm:$0xff]  }
  0x6a   : > { %648 = vmatprep.subr.bf16.mxu0 %v1376_v20  ;;  %709 = vmatprep.subr.bf16.mxu1 %v1378_v21  ;;  %v1429_v56 = vld [vmem:[#allocation5 + $0x148] ss:$16 sps:$4 sm:$0xff]   ;;  %v1430_v57 = vld [vmem:[#allocation5 + $0x124] ss:$16 sps:$4 sm:$0xff]   ;;  %v1432_v58 = vld [vmem:[#allocation5 + $0x12c] ss:$16 sps:$4 sm:$0xff]  }
  0x6b   : > { %v1434_v59 = vld [vmem:[#allocation5 + $0x120] ss:$16 sps:$4 sm:$0xff]   ;;  %v1435_v60 = vld [vmem:[#allocation5 + $0x128] ss:$16 sps:$4 sm:$0xff]   ;;  %v1436_v61 = vld [vmem:[#allocation5 + $0x104] ss:$16 sps:$4 sm:$0xff]  }
  0x6c   : > { %v1438_v62 = vld [vmem:[#allocation5 + $0x10c] ss:$16 sps:$4 sm:$0xff]   ;;  %v1440_v63 = vld [vmem:[#allocation5 + $0x100] ss:$16 sps:$4 sm:$0xff]   ;;  %v1441_v0 = vld [vmem:[#allocation5 + $0x108] ss:$16 sps:$4 sm:$0xff]  }
  0x6d   : > { %649 = vmatpush1.bf16.msra.mxu0 %v1380_v22  ;;  %710 = vmatpush1.bf16.msra.mxu1 %v1381_v23  ;;  %v1450_v1 = vld [vmem:[#allocation7 + $0x78] sm:$0xff]   ;;  %v1445_v3 = vld [vmem:[%s1791_s8 + $0x14] ss:$8 sps:$4 sm:$0xff]   ;;  %v1447_v9 = vld [vmem:[%s1791_s8 + $0x10] ss:$8 sps:$4 sm:$0xff]   ;;  %s218_s18 = scalar_lea.vmem [#allocation8], %s1270_s6 }
  0x6e   : > { %650 = vmatprep.subr.bf16.mxu0 %v1382_v24  ;;  %711 = vmatprep.subr.bf16.mxu1 %v1384_v25  ;;  %v1442_v2 = vld [vmem:[%s1791_s8] ss:$8 sps:$4 sm:$0xff]   ;;  %v1454_v8 = vld [vmem:[#allocation7 + $0x68] sm:$0xff]   ;;  %s1024_s20 = sshll.u32 %s218_s18, 4  ;;  %s1217_s25 = smul.u32 640, %s1679_s16  ;;  %s1809_s20 = int_to_ptr.vmem [resolvable:$true] %s1024_s20 }
  0x6f   : > { %v1451_v4 = vld [vmem:[#allocation7 + $0x38] sm:$0xff]   ;;  %v1452_v5 = vld [vmem:[#allocation7 + $0x70] sm:$0xff]   ;;  %v1455_v11 = vld [vmem:[#allocation7 + $0x28] sm:$0xff]   ;;  %s1011_s10 = scalar_lea.sflag [#allocation4], %s1785_s5  ;;  %s1556_s11 = scalar_lea.vmem %s1809_s20, 640 }
  0x70   : > { %v226_v6 = vld [vmem:[%s1791_s8 + $0x20] sm:$0xff]  ;;  %v1456_v12 = vld [vmem:[#allocation7 + $0x60] sm:$0xff]   ;;  %v1462_v19 = vld [vmem:[#allocation7 + $0x48] sm:$0xff]   ;;  %s1814_s4 = scalar_lea.hbm %s1860_s3, %s1217_s25  ;;  %p1557_p11 = scmp.ne.s32.totalorder %s1809_s20, %s1556_s11 }
  0x71   : > { %651 = vmatpush1.bf16.msra.mxu0 %v1386_v26  ;;  %712 = vmatpush1.bf16.msra.mxu1 %v1387_v27  ;;  %v1453_v7 = vld [vmem:[#allocation7 + $0x30] sm:$0xff]   ;;  %v1131_v10 = vcombine.high %v226_v6, %v226_v6  ;;  %v1457_v13 = vld [vmem:[#allocation7 + $0x20] sm:$0xff]   ;;  %v1458_v14 = vld [vmem:[#allocation7 + $0x58] sm:$0xff]   ;;  %v1130_v15 = vcombine.low %v226_v6, %v226_v6  ;;  %p1876_p10 = scmp.ne.s32.totalorder %s1870_s21, 0  ;;  %s1635_s16 = smov [#allocation8]  }
  0x72   : > { %652 = vmatprep.subr.bf16.mxu0 %v1388_v28  ;;  %713 = vmatprep.subr.bf16.mxu1 %v1390_v29  ;;  %v1459_v16 = vld [vmem:[#allocation7 + $0x18] sm:$0xff]   ;;  %v1460_v17 = vld [vmem:[#allocation7 + $0x50] sm:$0xff]   ;;  %v1463_v20 = vld [vmem:[#allocation7 + $0x8] sm:$0xff]   ;;  %s1560_s22 = sshll.u32 %s1635_s16, 4  ;;  %s1561_s22 = int_to_ptr.vmem [resolvable:$false] %s1560_s22 }
  0x73   : > { %v1461_v18 = vld [vmem:[#allocation7 + $0x10] sm:$0xff]   ;;  %v1464_v21 = vld [vmem:[#allocation7 + $0x40] sm:$0xff]   ;;  %p1558_p1 = pnand %p1557_p11, %p1876_p10  ;;  %s1562_s23 = scalar_lea.vmem %s1561_s22, 1280 }
  0x74   : > { %v1465_v22 = vld [vmem:[#allocation7] sm:$0xff]   ;;  %p1563_p6 = scmp.lt.s32.totalorder %s1809_s20, %s1561_s22  ;;  %p1564_p12 = scmp.lt.s32.totalorder %s1562_s23, %s1556_s11 }
  0x75   : > { %653 = vmatpush1.bf16.msra.mxu0 %v1392_v30  ;;  %714 = vmatpush1.bf16.msra.mxu1 %v1393_v31  ;;  %p1559_p2 = pneg %p1558_p1 }
  0x76   : > { %654 = vmatprep.subr.bf16.mxu0 %v1394_v32  ;;  %715 = vmatprep.subr.bf16.mxu1 %v1396_v33  ;;  %p1565_p3 = por %p1564_p12, %p1563_p6 }
  0x78   : > { %p1566_p9 = pnand %p1565_p3, %p1559_p2 }
  0x79   : > { %655 = vmatpush2.bf16.msra.mxu0 %v1398_v34  ;;  %716 = vmatpush2.bf16.msra.mxu1 %v1399_v35 }
  0x7a   : > { %656 = vmatprep.subr.bf16.mxu0 %v1400_v36  ;;  %717 = vmatprep.subr.bf16.mxu1 %v1402_v37 }
  0x7d   : > { %657 = vmatpush2.bf16.msra.mxu0 %v1404_v38  ;;  %718 = vmatpush2.bf16.msra.mxu1 %v1405_v39 }
  0x7e   : > { %658 = vmatprep.subr.bf16.mxu0 %v1406_v40  ;;  %719 = vmatprep.subr.bf16.mxu1 %v1408_v41 }
  0x81   : > { %659 = vmatpush2.bf16.msra.mxu0 %v1410_v42  ;;  %720 = vmatpush2.bf16.msra.mxu1 %v1411_v43 }
  0x82   : > { %660 = vmatprep.subr.bf16.mxu0 %v1412_v44  ;;  %721 = vmatprep.subr.bf16.mxu1 %v1414_v45 }
  0x85   : > { %661 = vmatpush2.bf16.msra.mxu0 %v1416_v46  ;;  %722 = vmatpush2.bf16.msra.mxu1 %v1417_v48 }
  0x86   : > { %662 = vmatprep.subr.bf16.mxu0 %v1418_v49  ;;  %723 = vmatprep.subr.bf16.mxu1 %v1420_v50 }
  0x89   : > { %663 = vmatpush2.bf16.msra.mxu0 %v1422_v51  ;;  %724 = vmatpush2.bf16.msra.mxu1 %v1423_v52 }
  0x8a   : > { %664 = vmatprep.subr.bf16.mxu0 %v1424_v53  ;;  %725 = vmatprep.subr.bf16.mxu1 %v1426_v54 }
  0x8d   : > { %665 = vmatpush2.bf16.msra.mxu0 %v1428_v55  ;;  %726 = vmatpush2.bf16.msra.mxu1 %v1429_v56 }
  0x8e   : > { %666 = vmatprep.subr.bf16.mxu0 %v1430_v57  ;;  %727 = vmatprep.subr.bf16.mxu1 %v1432_v58 }
  0x91   : > { %667 = vmatpush2.bf16.msra.mxu0 %v1434_v59  ;;  %728 = vmatpush2.bf16.msra.mxu1 %v1435_v60 }
  0x92   : > { %668 = vmatprep.subr.bf16.mxu0 %v1436_v61  ;;  %729 = vmatprep.subr.bf16.mxu1 %v1438_v62 }
  0x95   : > { %669 = vmatpush2.bf16.msra.mxu0 %v1440_v63  ;;  %730 = vmatpush2.bf16.msra.mxu1 %v1441_v0 }
  0x96   : > { %1219 = vmatprep.subr.bf16.mxu0 %v1450_v1  ;;  %1253 = vmatprep.subr.bf16.mxu1 %v1450_v1 }
  0x98   : > { %671 = vmatmul.mubr.bf16.vlgmr.msra.gmra.mxu0 %v1442_v2  ;;  %732 = vmatmul.mubr.bf16.vlgmr.msra.gmra.mxu1 %v1442_v2 }
  0x99   : > { %680 = vmatprep.mubr.bf16.mxu0 %v1445_v3  ;;  %741 = vmatprep.mubr.bf16.mxu1 %v1445_v3 }
  0x9a   : > { %1220 = vmatpush3.bf16.msra.mxu0 %v1451_v4  ;;  %1261 = vmatpush3.bf16.msra.mxu1 %v1451_v4 }
  0x9b   : > { %1221 = vmatprep.subr.bf16.mxu0 %v1452_v5  ;;  %1254 = vmatprep.subr.bf16.mxu1 %v1452_v5 }
  0x9e   : > { %1222 = vmatpush3.bf16.msra.mxu0 %v1453_v7  ;;  %1262 = vmatpush3.bf16.msra.mxu1 %v1453_v7 }
  0x9f   : > { %1223 = vmatprep.subr.bf16.mxu0 %v1454_v8  ;;  %1255 = vmatprep.subr.bf16.mxu1 %v1454_v8 }
  0xa0   : > { %681 = vmatmul.mubr.bf16.gmra.mxu0 %v1447_v9  ;;  %742 = vmatmul.mubr.bf16.gmra.mxu1 %v1447_v9 }
  0xa1   : > { %690 = vmatprep.mubr.bf16.mxu0 %v1131_v10  ;;  %751 = vmatprep.mubr.bf16.mxu1 %v1131_v10 }
  0xa2   : > { %1224 = vmatpush3.bf16.msra.mxu0 %v1455_v11  ;;  %1263 = vmatpush3.bf16.msra.mxu1 %v1455_v11 }
  0xa3   : > { %1225 = vmatprep.subr.bf16.mxu0 %v1456_v12  ;;  %1256 = vmatprep.subr.bf16.mxu1 %v1456_v12 }
  0xa6   : > { %1226 = vmatpush3.bf16.msra.mxu0 %v1457_v13  ;;  %1264 = vmatpush3.bf16.msra.mxu1 %v1457_v13 }
  0xa7   : > { %1227 = vmatprep.subr.bf16.mxu0 %v1458_v14  ;;  %1257 = vmatprep.subr.bf16.mxu1 %v1458_v14 }
  0xa8   : > { %691 = vmatmul.mubr.bf16.gmra.mxu0 %v1130_v15  ;;  %752 = vmatmul.mubr.bf16.gmra.mxu1 %v1130_v15 }
  0xaa   : > { %1228 = vmatpush3.bf16.msra.mxu0 %v1459_v16  ;;  %1265 = vmatpush3.bf16.msra.mxu1 %v1459_v16 }
  0xab   : > { %1229 = vmatprep.subr.bf16.mxu0 %v1460_v17  ;;  %1258 = vmatprep.subr.bf16.mxu1 %v1460_v17 }
  0xae   : > { %1230 = vmatpush3.bf16.msra.mxu0 %v1461_v18  ;;  %1266 = vmatpush3.bf16.msra.mxu1 %v1461_v18 }
  0xaf   : > { %1231 = vmatprep.subr.bf16.mxu0 %v1462_v19  ;;  %1259 = vmatprep.subr.bf16.mxu1 %v1462_v19 }
  0xb2   : > { %1232 = vmatpush3.bf16.msra.mxu0 %v1463_v20  ;;  %1267 = vmatpush3.bf16.msra.mxu1 %v1463_v20 }
  0xb3   : > { %1233 = vmatprep.subr.bf16.mxu0 %v1464_v21  ;;  %1260 = vmatprep.subr.bf16.mxu1 %v1464_v21 }
  0xb6   : > { %1234 = vmatpush3.bf16.msra.mxu0 %v1465_v22  ;;  %1268 = vmatpush3.bf16.msra.mxu1 %v1465_v22 }
 0x158   : > { %v672_v23 = vpop.f32.mrf.mxu0  ;;  %v733_v24 = vpop.f32.mrf.mxu1 }
 0x159   : > { %v760_v33 = vmul.f32 %v672_v23, %v672_v23  ;;  %v770_v34 = vmul.f32 %v733_v24, %v733_v24 }
 0x15a   : > { %v674_v25 = vpop.f32.mrf.mxu0  ;;  %v735_v26 = vpop.f32.mrf.mxu1 }
 0x15b   : > { %v761_v29 = vmul.f32 %v674_v25, %v674_v25  ;;  %v771_v30 = vmul.f32 %v735_v26, %v735_v26  ;;  %v780_v44 = vadd.f32 %v770_v34, %v760_v33 }
 0x15c   : > { %v676_v27 = vpop.f32.mrf.mxu0  ;;  %v737_v28 = vpop.f32.mrf.mxu1 }
 0x15d   : > { %v762_v31 = vmul.f32 %v676_v27, %v676_v27  ;;  %v772_v32 = vmul.f32 %v737_v28, %v737_v28  ;;  %v781_v42 = vadd.f32 %v771_v30, %v761_v29 }
 0x15e   : > { %v678_v35 = vpop.f32.mrf.mxu0  ;;  %v739_v36 = vpop.f32.mrf.mxu1 }
 0x15f   : > { %v763_v37 = vmul.f32 %v678_v35, %v678_v35  ;;  %v773_v38 = vmul.f32 %v739_v36, %v739_v36  ;;  %v782_v39 = vadd.f32 %v772_v32, %v762_v31 }
 0x160   : > { %v682_v40 = vpop.f32.mrf.mxu0  ;;  %v743_v41 = vpop.f32.mrf.mxu1 }
 0x161   : > { %v783_v43 = vadd.f32 %v773_v38, %v763_v37  ;;  %v790_v48 = vpack.c.bf16 %v782_v39, %v780_v44  ;;  %v764_v55 = vmul.f32 %v682_v40, %v682_v40  ;;  %v774_v56 = vmul.f32 %v743_v41, %v743_v41 }
 0x162   : > { %v684_v45 = vpop.f32.mrf.mxu0  ;;  %v745_v46 = vpop.f32.mrf.mxu1 }
 0x163   : > { %v791_v47 = vpack.c.bf16 %v783_v43, %v781_v42  ;;  %v765_v51 = vmul.f32 %v684_v45, %v684_v45  ;;  %v775_v52 = vmul.f32 %v745_v46, %v745_v46  ;;  %v784_v2 = vadd.f32 %v774_v56, %v764_v55 }
 0x164   : > { %v686_v49 = vpop.f32.mrf.mxu0  ;;  %v747_v50 = vpop.f32.mrf.mxu1 }
 0x165   : > { %v766_v53 = vmul.f32 %v686_v49, %v686_v49  ;;  %v776_v54 = vmul.f32 %v747_v50, %v747_v50  ;;  %956 = vmatprep.mubr.bf16.mxu0 %v791_v47  ;;  %v785_v0 = vadd.f32 %v775_v52, %v765_v51 }
 0x166   : > { %v688_v57 = vpop.f32.mrf.mxu0  ;;  %v749_v58 = vpop.f32.mrf.mxu1  ;;  %957 = vmatmul.mubr.bf16.vlgmr.msra.gmra.mxu0 %v790_v48 }
 0x167   : > { %v767_v59 = vmul.f32 %v688_v57, %v688_v57  ;;  %v777_v60 = vmul.f32 %v749_v58, %v749_v58  ;;  %v786_v61 = vadd.f32 %v776_v54, %v766_v53 }
 0x168   : > { %v692_v62 = vpop.f32.mrf.mxu0  ;;  %v753_v63 = vpop.f32.mrf.mxu1 }
 0x169   : > { %v787_v1 = vadd.f32 %v777_v60, %v767_v59  ;;  %v792_v8 = vpack.c.bf16 %v786_v61, %v784_v2  ;;  %v768_v9 = vmul.f32 %v692_v62, %v692_v62  ;;  %v778_v10 = vmul.f32 %v753_v63, %v753_v63 }
 0x16a   : > { %v694_v3 = vpop.f32.mrf.mxu0  ;;  %v755_v4 = vpop.f32.mrf.mxu1 }
 0x16b   : > { %v769_v5 = vmul.f32 %v694_v3, %v694_v3  ;;  %v779_v6 = vmul.f32 %v755_v4, %v755_v4  ;;  %v793_v7 = vpack.c.bf16 %v787_v1, %v785_v0  ;;  %v788_v17 = vadd.f32 %v778_v10, %v768_v9 }
 0x16c   : > { %v696_v11 = vpop.f32.mrf.mxu0  ;;  %v757_v12 = vpop.f32.mrf.mxu1 }
 0x16d   : > { %v789_v13 = vadd.f32 %v779_v6, %v769_v5  ;;  %964 = vmatprep.mubr.bf16.mxu1 %v793_v7  ;;  %v794_v18 = vpack.c.bf16 %v788_v17, %v788_v17 }
 0x16e   : > { %v697_v14 = vpop.f32.mrf.mxu0  ;;  %v758_v15 = vpop.f32.mrf.mxu1  ;;  %965 = vmatmul.mubr.bf16.vlgmr.msra.gmra.mxu1 %v792_v8 }
 0x16f   : > { %v795_v16 = vpack.c.bf16 %v789_v13, %v789_v13 }
 0x171   : > { %972 = vmatprep.mubr.bf16.mxu1 %v795_v16 }
 0x176   : > { %973 = vmatmul.mubr.bf16.gmra.mxu1 %v794_v18 }
 0x226   : > { %v1235_v19 = vpop.f32.mrf.mxu0 }
 0x228   : > { %v1236_v20 = vpop.f32.mrf.mxu0 }
 0x229   : > { %v1237_v21 = vadd.f32 %v1236_v20, %v1235_v19 }
 0x22a   : > { %v1238_v22 = vpop.f32.mrf.mxu0 }
 0x22b   : > { %v980_v23 = vmax.f32 %v1237_v21, 1e-10 }
 0x22c   : > { %v1239_v24 = vpop.f32.mrf.mxu0 }
 0x22d   : > { %1466 = vlog2.f32 %v980_v23  ;;  %v1240_v25 = vadd.f32 %v1239_v24, %v1238_v22 }
 0x22e   : > { %v1241_v26 = vpop.f32.mrf.mxu1 }
 0x22f   : > { %v981_v27 = vmax.f32 %v1240_v25, 1e-10 }
 0x230   : > { %v1242_v28 = vpop.f32.mrf.mxu1 }
 0x231   : > { %1468 = vlog2.f32 %v981_v27  ;;  %v1243_v29 = vadd.f32 %v1242_v28, %v1241_v26 }
 0x232   : > { %v1244_v30 = vpop.f32.mrf.mxu1 }
 0x233   : > { %v982_v31 = vmax.f32 %v1243_v29, 1e-10 }
 0x234   : > { %v1245_v32 = vpop.f32.mrf.mxu1 }
 0x235   : > { %1470 = vlog2.f32 %v982_v31  ;;  %v1246_v33 = vadd.f32 %v1245_v32, %v1244_v30 }
 0x236   : > { %v1247_v34 = vpop.f32.mrf.mxu1 }
 0x237   : > { %v983_v35 = vmax.f32 %v1246_v33, 1e-10 }
 0x238   : > { %v1248_v36 = vpop.f32.mrf.mxu1 }
 0x239   : > { %1472 = vlog2.f32 %v983_v35  ;;  %v1249_v37 = vadd.f32 %v1248_v36, %v1247_v34 }
 0x23a   : > { %v1467_v38 = vpop.eup %1466  ;;  %v1250_v39 = vpop.f32.mrf.mxu1 }
 0x23b   : > { %v986_v40 = vmul.f32 0.6931472, %v1467_v38  ;;  %v984_v41 = vmax.f32 %v1249_v37, 1e-10 }
 0x23c   : > { %v1251_v42 = vpop.f32.mrf.mxu1 }
 0x23d   : > { %v995_v43 = vmul.f32 0.4342945, %v986_v40  ;;  %1474 = vlog2.f32 %v984_v41 }
 0x23e   : > { %v1469_v44 = vpop.eup %1468 }
 0x23f   : > { %v1000_v45 = vmul.f32 10.0, %v995_v43  ;;  %v988_v46 = vmul.f32 0.6931472, %v1469_v44 }
 0x241   : > { %1005 = vst [vmem:[%s218_s18] sm:$0xff] %v1000_v45  ;;  %v996_v47 = vmul.f32 0.4342945, %v988_v46 }
 0x242   : > { %v1471_v48 = vpop.eup %1470 }
 0x243   : > { %v1001_v49 = vmul.f32 10.0, %v996_v47  ;;  %v990_v50 = vmul.f32 0.6931472, %v1471_v48 }
 0x245   : > { %1006 = vst [vmem:[%s218_s18 + $0x8] sm:$0xff] %v1001_v49  ;;  %v997_v51 = vmul.f32 0.4342945, %v990_v50 }
 0x246   : > { %v1473_v52 = vpop.eup %1472 }
 0x247   : > { %v1002_v53 = vmul.f32 10.0, %v997_v51  ;;  %v992_v54 = vmul.f32 0.6931472, %v1473_v52 }
 0x249   : > { %1007 = vst [vmem:[%s218_s18 + $0x10] sm:$0xff] %v1002_v53  ;;  %v998_v55 = vmul.f32 0.4342945, %v992_v54 }
 0x24a   : > { %v1475_v56 = vpop.eup %1474 }
 0x24b   : > { %v1003_v57 = vmul.f32 10.0, %v998_v55  ;;  %v994_v58 = vmul.f32 0.6931472, %v1475_v56 }
 0x24d   : > { %1008 = vst [vmem:[%s218_s18 + $0x18] sm:$0xff] %v1003_v57  ;;  %v999_v59 = vmul.f32 0.4342945, %v994_v58 }
 0x24f   : > { %v1004_v60 = vmul.f32 10.0, %v999_v59 }
 0x251   : > { %1009 = vst [vmem:[%s218_s18 + $0x20] sm:$0xff] %v1004_v60 }
 0x252   : > { %1569 = shalt.err (!%p1566_p9)
}
 0x253   : > { %s1570_s24 = scalar_lea.hbm %s1814_s4, 640  ;;  %s1574_s29 = scalar_lea.hbm %s1860_s3, 1280 }
 0x254   : > { %p1571_p13 = scmp.ne.s32.totalorder %s1814_s4, %s1570_s24  ;;  %p1575_p4 = scmp.lt.s32.totalorder %s1814_s4, %s1860_s3 }
 0x255   : > { %p1576_p8 = scmp.lt.s32.totalorder %s1574_s29, %s1570_s24 }
 0x256   : > { %p1572_p5 = pnand %p1571_p13, %p1876_p10 }
 0x257   : > { %p1577_p7 = por %p1576_p8, %p1575_p4 }
 0x258   : > { %p1573_p0 = pneg %p1572_p5 }
 0x25a   : > { %p1578_p11 = pnand %p1577_p7, %p1573_p0 }
 0x25c   : > { %1581 = shalt.err (!%p1578_p11)
}
 0x25d   : > { %s1636_s8 = smov 128   ;;  %s1637_s18 = smov 8  }
 0x25e   : > { %1281 = dma.vmem_to_hbm [thread:$0]  (%p1876_p10), %s1809_s20, 640, %s1814_s4, %s1011_s10, %s1636_s8, %s1636_s8, %s1637_s18  }
 0x25f PF: > { %s1039_s25 = sand.u32 1, %s1612_s12   ;;  %p1877_p1 = scmp.ne.s32.totalorder %s1866_s19, 0 }
 0x260   : > { %p1878_p2 = scmp.ge.s32.totalorder %s1624_s15, 2  ;;  %s1040_s28 = scalar_lea.sflag [#allocation4], %s1039_s25 }
 0x262   : > { %p1295_p6 = pnand %p1878_p2, %p1877_p1 }
 0x264   : > { %p1296_p12 = pneg %p1295_p6 }
 0x266   : > { %1607 = dma.done.wait (%p1296_p12), %s1040_s28, 640  }
 0x267   : > { %1609 = vsyncadd (%p1296_p12), %s1040_s28, 4294966656  ;;  %p17_p3 = scmp.ge.s32.totalorder %s1730_s9, 4   ;;  %s1879_s12 = smov %s1616_s13 }
 0x268   : > { %s1880_s13 = smov %s1620_s14  ;;  %s1881_s14 = smov %s1739_s17 }
 0x269   : > { %s1882_s15 = smov %s1730_s9  ;;  %19 = sbr.rel (!%p17_p3) target bundleno = 6 (0x6), region = 85 }
 0x26e   :  { %1045 = vsyncpa [#allocation3], 1 }
 0x26f   :  { %1047 = vsyncpa [#allocation3 + $0x1], 1 }
 0x270   :  { %1048 = vsyncpa [#allocation6], 1 }
 0x271   :  { %1049 = vsyncpa [#allocation4], 1 }
 0x272   :  { %1051 = vsyncpa [#allocation4 + $0x1], 1 }

</bundles_post_ra>
